<compile_context>
chip_gen: v6e
topology: v6e:2x2x1
jax: 0.10.0
libtpu: 0.0.40
codegen_flags: <defaults>
</compile_context>

<pallas_src>
import math

import jax
import jax.numpy as jnp
from jax.experimental import pallas as pl
from jax.experimental.pallas import tpu as pltpu


def _gsn_kernel(x_ref, stats_ref, o_ref):
    # x_ref: (tile_rows, W); stats_ref: (2, W) f32 — row 0: scale, row 1: bias.
    x = x_ref[...].astype(jnp.float32)
    scale = stats_ref[0:1, :]
    bias = stats_ref[1:2, :]
    o_ref[...] = (x * scale + bias).astype(o_ref.dtype)


def _sublane_multiple(dtype) -> int:
    # Sublane packing granularity: 8 for 4-byte, 16 for 2-byte, 32 for 1-byte.
    itemsize = jnp.dtype(dtype).itemsize
    return max(8, 32 // max(1, itemsize))


def _cdiv(a: int, b: int) -> int:
    return -(-a // b)


def _round_up(a: int, b: int) -> int:
    return _cdiv(a, b) * b


def _chip_defaults():
    """(target_block_bytes, vmem_limit_bytes) per TPU generation."""
    kind = ""
    try:
        kind = jax.devices()[0].device_kind.lower()
    except Exception:
        pass
    if "v7" in kind:
        # v7x: ~3.2 TB/s HBM per TC, 64 MiB physical VMEM -> larger blocks so
        # the ~0.35 us per-step overhead stays <~5%; 4 x 12 MiB = 48 MiB leaves
        # headroom below physical VMEM for Mosaic scratch.
        return 12 * 1024 * 1024, 48 * 1024 * 1024
    # v5e / v6e: 4 MiB blocks already sit past the HBM-roofline knee.
    return 4 * 1024 * 1024, 32 * 1024 * 1024


def _pick_tile_rows(n_rows, width, dtype, *, target_block_bytes,
                    vmem_limit_bytes, min_grid_steps=4):
    """Row-tile size targeting ~target_block_bytes per block.

    Budgets against the lane-padded width (VMEM pads the last dim to 128) and
    against 4 x block bytes (double-buffered input + output) of the VMEM
    limit, and caps the tile so the grid keeps >= min_grid_steps steps.
    """
    itemsize = jnp.dtype(dtype).itemsize
    sub = _sublane_multiple(dtype)
    width_padded = _round_up(width, 128)
    row_bytes = width_padded * itemsize

    vmem_budget = max(vmem_limit_bytes - 4 * 1024 * 1024, 1024 * 1024)
    block_bytes = min(target_block_bytes, vmem_budget // 4)

    rows = max(sub, (block_bytes // row_bytes) // sub * sub)
    # Keep >= min_grid_steps steps (v7x megacore sharding + DMA/compute overlap).
    rows = min(rows, max(sub, _round_up(_cdiv(n_rows, min_grid_steps), sub)))
    # Never taller than the (sublane-rounded) whole array.
    rows = min(rows, max(sub, _round_up(n_rows, sub)))
    return rows


def global_stats_normalization(x, mean, invstddev, *, tile_rows=None,
                               donate_x=False):
    """out = (x - mean) * invstddev; x: [..., D], mean/invstddev: [D]."""
    orig_shape = x.shape
    D = int(orig_shape[-1])
    x2 = x.reshape(-1, D)
    R = x2.shape[0]

    target_block_bytes, vmem_limit_bytes = _chip_defaults()

    # Lane packing: fold k consecutive rows into one lane-dense row of width
    # k*D (a multiple of 128).  The reshape is free for a contiguous array.
    k = 128 // math.gcd(D, 128)
    if k > 1 and R % k == 0:
        W = k * D
        xv = x2.reshape(R // k, W)
    else:
        # TODO(synk): when R % k != 0, packing would need an extra copy for the
        # <k-row remainder; fall back to the (lane-masked) unpacked layout.
        k = 1
        W = D
        xv = x2
    Rv = xv.shape[0]

    # Fold (x - mean) * inv into one FMA: x*scale + bias (f32 stats), packed
    # as a single resident (2, W) operand: row 0 = scale, row 1 = bias.
    scale = invstddev.astype(jnp.float32)
    bias = -mean.astype(jnp.float32) * scale
    stats = jnp.stack([scale, bias], axis=0)      # (2, D)
    if k > 1:
        stats = jnp.tile(stats, (1, k))           # (2, k*D), matches packed rows

    if tile_rows is None:
        tile_rows = _pick_tile_rows(
            Rv, W, x.dtype,
            target_block_bytes=target_block_bytes,
            vmem_limit_bytes=vmem_limit_bytes)

    grid = (pl.cdiv(Rv, tile_rows),)

    out = pl.pallas_call(
        _gsn_kernel,
        out_shape=jax.ShapeDtypeStruct((Rv, W), x.dtype),
        grid_spec=pltpu.PrefetchScalarGridSpec(
            num_scalar_prefetch=0,
            grid=grid,
            in_specs=[
                pl.BlockSpec((tile_rows, W), lambda i: (i, 0)),
                pl.BlockSpec((2, W), lambda i: (0, 0)),
            ],
            out_specs=pl.BlockSpec((tile_rows, W), lambda i: (i, 0)),
        ),
        input_output_aliases=({0: 0} if donate_x else {}),
        compiler_params=pltpu.CompilerParams(
            dimension_semantics=("parallel",),
            vmem_limit_bytes=vmem_limit_bytes,
        ),
    )(xv, stats)

    return out.reshape(orig_shape)


if __name__ == "__main__":
    key = jax.random.PRNGKey(0)
    keys = jax.random.split(key, 9)

    # TODO(synk): mean/invstddev come from a JSON file in the PyTorch module;
    # synthesized deterministically here.

    # --- Case 1: D = 128 (already lane-dense). ---
    B, T, D = 2, 8, 128
    x = jax.random.normal(keys[0], (B, T, D), dtype=jnp.float32)
    mean = jax.random.normal(keys[1], (D,), dtype=jnp.float32)
    inv = jax.nn.softplus(jax.random.normal(keys[2], (D,), dtype=jnp.float32)) + 0.1
    out = jax.block_until_ready(global_stats_normalization(x, mean, inv))
    ref = (x - mean) * inv
    assert out.shape == x.shape and out.dtype == x.dtype
    assert jnp.allclose(out, ref, atol=1e-5, rtol=1e-5)

    # --- Case 2: D = 80, rows divisible by k=8 -> lane-packed (R//8, 640) path
    # with an unmasked-store, 128-multiple output width and a partial block. ---
    B2, T2, D2 = 2, 40, 80
    x2 = jax.random.normal(keys[3], (B2, T2, D2), dtype=jnp.float32)
    mean2 = jax.random.normal(keys[4], (D2,), dtype=jnp.float32)
    inv2 = jax.nn.softplus(jax.random.normal(keys[5], (D2,), dtype=jnp.float32)) + 0.1
    out2 = jax.block_until_ready(global_stats_normalization(x2, mean2, inv2))
    ref2 = (x2 - mean2) * inv2
    assert out2.shape == x2.shape and out2.dtype == x2.dtype
    assert jnp.allclose(out2, ref2, atol=1e-5, rtol=1e-5)

    # --- Case 3: D = 80, rows NOT divisible by 8 -> unpacked fallback path,
    # exercising the pad-free partial trailing block. ---
    B3, T3, D3 = 3, 7, 80
    x3 = jax.random.normal(keys[6], (B3, T3, D3), dtype=jnp.float32)
    mean3 = jax.random.normal(keys[7], (D3,), dtype=jnp.float32)
    inv3 = jax.nn.softplus(jax.random.normal(keys[8], (D3,), dtype=jnp.float32)) + 0.1
    out3 = jax.block_until_ready(global_stats_normalization(x3, mean3, inv3))
    ref3 = (x3 - mean3) * inv3
    assert out3.shape == x3.shape and out3.dtype == x3.dtype
    assert jnp.allclose(out3, ref3, atol=1e-5, rtol=1e-5)

    print("KERNEL_OK")
</pallas_src>

<mosaic_0001>
module attributes {stable_mosaic.version = 11 : i64} {
  func.func @_gsn_kernel(%arg0: i32, %arg1: memref<8x128xf32, #tpu.memory_space<vmem>>, %arg2: memref<2x128xf32, #tpu.memory_space<vmem>>, %arg3: memref<8x128xf32, #tpu.memory_space<vmem>>) attributes {dimension_semantics = [#tpu.dimension_semantics<parallel>], iteration_bounds = array<i64: 2>, scalar_prefetch = 0 : i64, scratch_operands = 0 : i64, tpu.core_type = #tpu.core_type<tc>, window_params = [{transform_indices = @transform_0, window_bounds = array<i64: 8, 128>}, {pipeline_mode = #tpu.pipeline_mode<synchronous>, transform_indices = @transform_1, window_bounds = array<i64: 2, 128>}, {transform_indices = @transform_2, window_bounds = array<i64: 8, 128>}]} {
    %c0 = arith.constant 0 : index
    %c0_0 = arith.constant 0 : index
    %0 = vector.load %arg1[%c0, %c0_0] : memref<8x128xf32, #tpu.memory_space<vmem>>, vector<8x128xf32>
    %c0_1 = arith.constant 0 : index
    %c0_2 = arith.constant 0 : index
    %1 = vector.load %arg2[%c0_1, %c0_2] : memref<2x128xf32, #tpu.memory_space<vmem>>, vector<1x128xf32>
    %c1 = arith.constant 1 : index
    %c0_3 = arith.constant 0 : index
    %2 = vector.load %arg2[%c1, %c0_3] : memref<2x128xf32, #tpu.memory_space<vmem>>, vector<1x128xf32>
    %3 = vector.broadcast %1 : vector<1x128xf32> to vector<8x128xf32>
    %4 = arith.mulf %0, %3 : vector<8x128xf32>
    %5 = vector.broadcast %2 : vector<1x128xf32> to vector<8x128xf32>
    %6 = arith.addf %4, %5 : vector<8x128xf32>
    %c0_4 = arith.constant 0 : index
    %c0_5 = arith.constant 0 : index
    %7 = vector.load %arg3[%c0_4, %c0_5] : memref<8x128xf32, #tpu.memory_space<vmem>>, vector<8x128xf32>
    tpu.vector_store %arg3[%c0_4, %c0_5], %6 {strides = array<i32>} : memref<8x128xf32, #tpu.memory_space<vmem>>, vector<8x128xf32>,
    return
  }
  func.func @transform_0(%arg0: i32) -> (i32, i32) {
    %c0_i32 = arith.constant 0 : i32
    %c0_i32_0 = arith.constant 0 : i32
    return %arg0, %c0_i32 : i32, i32
  }
  func.func @transform_1(%arg0: i32) -> (i32, i32) {
    %c0_i32 = arith.constant 0 : i32
    %c0_i32_0 = arith.constant 0 : i32
    %c0_i32_1 = arith.constant 0 : i32
    return %c0_i32, %c0_i32_0 : i32, i32
  }
  func.func @transform_2(%arg0: i32) -> (i32, i32) {
    %c0_i32 = arith.constant 0 : i32
    %c0_i32_0 = arith.constant 0 : i32
    return %arg0, %c0_i32 : i32, i32
  }
}

</mosaic_0001>

<bundles_post_ra>
// kernel: tpu_custom_call.1
= control target key start
LH: loop header
LB: loop body
LE: loop exit
PB: predicated region body
PF: predicated region fallthrough
CT: control target
= control target key end

     0   :  { %7 = vsyncpa [#allocation3], 0  ;;  %s661_s0 = inlined_call_operand.hbm [shape: f32[16,128], index: 0, kind: input, shape index: {}]   ;;  %s662_s1 = inlined_call_operand.hbm [shape: f32[2,128], index: 1, kind: input, shape index: {}]   ;;  %s663_s2 = inlined_call_operand.hbm [shape: f32[16,128], index: 2, kind: output, shape index: {}]  }
   0x1   :  { %9 = vsyncpa [#allocation3 + $0x1], 0 }
   0x2   :  { %10 = vsyncpa [#allocation6], 0 }
   0x3   :  { %11 = vsyncpa [#allocation4], 0 }
   0x4   :  { %13 = vsyncpa [#allocation4 + $0x1], 0  ;;  %s495_s9 = smov 0   ;;  %s497_s10 = smov 0  }
   0x5   :  { %s499_s11 = smov 0   ;;  %s501_s12 = smov 0  }
   0x6 LB: > { %s516_s13 = sadd.s32 4294967295, %s475_s12   ;;  %s280_s14 = sadd.s32 4294967294, %s475_s12   ;;  %s475_s12 = sphi %s501_s12, %s686_s12   ;;  %s471_s11 = sphi %s499_s11, %s685_s11   ;;  %s467_s10 = sphi %s497_s10, %s684_s10   ;;  %s463_s9 = sphi %s495_s9, %s683_s9  }
   0x7   : > { %p39_p0 = scmp.ne.s32.totalorder %s467_s10, %s463_s9  ;;  %p664_p1 = scmp.eq.s32.totalorder %s516_s13, 0 }
   0x8   : > { %p90_p3 = scmp.eq.s32.totalorder %s280_s14, 1  ;;  %p281_p5 = scmp.ge.s32.totalorder %s475_s12, 1 }
   0x9   : > { %p525_p4 = por %p664_p1, %p39_p0  ;;  %p97_p7 = scmp.lt.s32.totalorder %s475_s12, 3 }
   0xa   : > { %p530_p6 = por %p90_p3, %p39_p0  ;;  %s477_s18 = smov [#allocation5]  }
   0xb   : > { %s668_s15 = scalar_select %p525_p4, 1, 0 }
   0xc   : > { %s669_s16 = scalar_select %p530_p6, 1, 0 }
   0xd   : > { %p535_p8 = pnand %p281_p5, %p97_p7  ;;  %s110_s19 = sshll.u32 %s477_s18, 4  ;;  %s111_s19 = int_to_ptr.vmem [resolvable:$true] %s110_s19 }
   0xe   : > { %s543_s20 = sadd.s32 1, %s475_s12   ;;  %s26_s24 = sadd.s32 1, %s471_s11 }
   0xf   : > { %s670_s17 = scalar_select %p535_p8, 1, 0 }
  0x10   : > { %p304_p10 = pneg %p535_p8  ;;  %s23_s22 = ssub.s32 %s475_s12, %s543_s20 }
  0x11   : > { %p553_p12 = scmp.eq.s32.totalorder %s23_s22, 0  ;;  %p33_p13 = scmp.ne.s32.totalorder %s471_s11, %s467_s10 }
  0x12   : > { %p547_p11 = pnand %p304_p10, %p664_p1  ;;  %s364_s25 = scalar_lea.vmem %s111_s19, 32 }
  0x13   : > { %p365_p3 = scmp.ne.s32.totalorder %s111_s19, %s364_s25  ;;  %p372_p9 = scmp.lt.s32.totalorder %s111_s19, %s111_s19 }
  0x14   : > { %p355_p0 = pneg %p547_p11  ;;  %p373_p2 = scmp.lt.s32.totalorder %s364_s25, %s364_s25 }
  0x16   : > { %p367_p5 = pnand %p365_p3, %p355_p0  ;;  %p374_p10 = por %p373_p2, %p372_p9 }
  0x18   : > { %p368_p7 = pneg %p367_p5 }
  0x1a   : > { %p375_p1 = pnand %p374_p10, %p368_p7 }
  0x1c   : > { %378 = shalt.err (!%p375_p1)
}
  0x1d   : > { %307 = dma.hbm_to_vmem [thread:$0]  (!%p547_p11), %s662_s1, 32, %s111_s19, [#allocation6]  }
  0x1e   : > { %s570_s28 = scalar_select %p553_p12, %s471_s11, %s26_s24  }
  0x1f   : > { %p34_p1 = scmp.eq.s32.totalorder %s475_s12, 0  ;;  %p673_p2 = scmp.eq.s32.totalorder %s516_s13, 1 }
  0x20   : > { %p317_p0 = scmp.lt.s32.totalorder %s475_s12, 2  ;;  %s121_s30 = sand.u32 1, %s471_s11  }
  0x21   : > { %p578_p9 = por %p673_p2, %p33_p13  ;;  %p35_p3 = por %p34_p1, %p33_p13 }
  0x22   : > { %s284_s3 = sshll.u32 %s121_s30, 3  ;;  %s285_s4 = sshll.u32 %s475_s12, 7 }
  0x23   : > { %s674_s29 = scalar_select %p578_p9, 1, 0 }
  0x24   : > { %s591_s7 = scalar_lea.hbm %s661_s0, %s285_s4  ;;  %s125_s8 = scalar_lea.vmem [#allocation2], %s284_s3 }
  0x25   : > { %s132_s14 = sshll.u32 %s125_s8, 4  ;;  %p593_p11 = pnand %p317_p0, %p35_p3  ;;  %s133_s14 = int_to_ptr.vmem [resolvable:$true] %s132_s14 }
  0x26   : > { %s122_s19 = scalar_lea.sflag [#allocation3], %s121_s30  ;;  %s379_s21 = scalar_lea.hbm %s591_s7, 128 }
  0x27   : > { %p380_p12 = scmp.ne.s32.totalorder %s591_s7, %s379_s21  ;;  %p381_p13 = pneg %p593_p11 }
  0x28   : > { %s384_s24 = scalar_lea.hbm %s661_s0, 256  ;;  %p385_p10 = scmp.lt.s32.totalorder %s591_s7, %s661_s0 }
  0x29   : > { %p382_p5 = pnand %p381_p13, %p380_p12  ;;  %p386_p1 = scmp.lt.s32.totalorder %s384_s24, %s379_s21 }
  0x2b   : > { %p383_p7 = pneg %p382_p5  ;;  %p387_p2 = por %p386_p1, %p385_p10 }
  0x2d   : > { %p388_p0 = pnand %p387_p2, %p383_p7 }
  0x2f   : > { %391 = shalt.err (!%p388_p0)
}
  0x30   : > { %s392_s27 = scalar_lea.vmem %s133_s14, 128  ;;  %s478_s30 = smov [#allocation2]  }
  0x31   : > { %p393_p3 = scmp.ne.s32.totalorder %s133_s14, %s392_s27  ;;  %s397_s3 = sshll.u32 %s478_s30, 4  ;;  %s398_s3 = int_to_ptr.vmem [resolvable:$false] %s397_s3 }
  0x32   : > { %s399_s4 = scalar_lea.vmem %s398_s3, 256  ;;  %p400_p12 = scmp.lt.s32.totalorder %s133_s14, %s398_s3 }
  0x33   : > { %p395_p6 = pnand %p393_p3, %p381_p13  ;;  %p401_p5 = scmp.lt.s32.totalorder %s399_s4, %s392_s27 }
  0x35   : > { %p396_p9 = pneg %p395_p6  ;;  %p402_p4 = por %p401_p5, %p400_p12 }
  0x37   : > { %p403_p8 = pnand %p402_p4, %p396_p9 }
  0x39   : > { %406 = shalt.err (!%p403_p8)
}
  0x3a   : > { %311 = dma.hbm_to_vmem [thread:$0]  (!%p593_p11), %s591_s7, 128, %s133_s14, %s122_s19  }
  0x3b   : > { %p676_p7 = scmp.ne.s32.totalorder %s670_s17, 0 }
  0x3c   : > { %s614_s5 = sand.u32 (!%p676_p7), 1, %s467_s10   ;;  %p677_p6 = scmp.ne.s32.totalorder (!%p676_p7), %s668_s15, 0 }
  0x3d   : > { %141 = sbr.rel (%p676_p7) target bundleno = 95 (0x5f), region = 28  ;;  %s287_s6 = sshll.u32 (!%p676_p7), %s614_s5, 3 }
  0x3e   : > { %s144_s8 = scalar_lea.sflag (!%p676_p7), [#allocation3], %s614_s5  ;;  %s147_s21 = scalar_lea.vmem (!%p676_p7), [#allocation2], %s287_s6 }
  0x42   : > { %450 = dma.done.wait (%p677_p6), %s144_s8, 128  }
  0x43   : > { %452 = vsyncadd (%p677_p6), %s144_s8, 4294967168  ;;  %p678_p4 = scmp.eq.s32.totalorder %s516_s13, 0 }
  0x45   : > { %454 = dma.done.wait (%p678_p4), [#allocation6], 32   ;;  %p679_p8 = pmov %p678_p4 }
  0x46   : > { %s171_s17 = scalar_lea.vmem [#allocation7], %s287_s6  ;;  %v172_v0 = vld [vmem:[%s147_s21] sm:$0xff]  ;;  %v290_v1 = vld [vmem:[#allocation5] ss:$0 sm:$0xff]  ;;  %v291_v2 = vld [vmem:[#allocation5 + $0x1] ss:$0 sm:$0xff] }
  0x47   : > { %456 = vsyncadd (%p679_p8), [#allocation6], 4294967264  ;;  %s200_s7 = sshll.u32 %s171_s17, 4  ;;  %s293_s14 = sshll.u32 %s516_s13, 7  ;;  %v179_v3 = vmul.f32 %v290_v1, %v172_v0  ;;  %s201_s7 = int_to_ptr.vmem [resolvable:$true] %s200_s7 }
  0x48   : > { %s198_s19 = scalar_lea.hbm %s663_s2, %s293_s14  ;;  %s187_s22 = scalar_lea.sflag [#allocation4], %s614_s5 }
  0x49   : > { %v184_v4 = vadd.f32 %v291_v2, %v179_v3  ;;  %s407_s23 = scalar_lea.vmem %s201_s7, 128  ;;  %p680_p11 = scmp.ne.s32.totalorder %s674_s29, 0 }
  0x4a   : > { %p408_p9 = scmp.ne.s32.totalorder %s201_s7, %s407_s23  ;;  %s479_s24 = smov [#allocation7]  }
  0x4b   : > { %185 = vst [vmem:[%s171_s17] sm:$0xff] %v184_v4  ;;  %s411_s25 = sshll.u32 %s479_s24, 4  ;;  %s412_s25 = int_to_ptr.vmem [resolvable:$false] %s411_s25 }
  0x4c   : > { %p409_p13 = pnand %p408_p9, %p680_p11  ;;  %s413_s26 = scalar_lea.vmem %s412_s25, 256 }
  0x4d   : > { %p414_p1 = scmp.lt.s32.totalorder %s201_s7, %s412_s25  ;;  %p415_p2 = scmp.lt.s32.totalorder %s413_s26, %s407_s23 }
  0x4e   : > { %p410_p10 = pneg %p409_p13 }
  0x4f   : > { %p416_p0 = por %p415_p2, %p414_p1 }
  0x51   : > { %p417_p3 = pnand %p416_p0, %p410_p10 }
  0x53   : > { %420 = shalt.err (!%p417_p3)
}
  0x54   : > { %s421_s13 = scalar_lea.hbm %s198_s19, 128  ;;  %s425_s3 = scalar_lea.hbm %s663_s2, 256 }
  0x55   : > { %p422_p12 = scmp.ne.s32.totalorder %s198_s19, %s421_s13  ;;  %p426_p6 = scmp.lt.s32.totalorder %s198_s19, %s663_s2 }
  0x56   : > { %p427_p4 = scmp.lt.s32.totalorder %s425_s3, %s421_s13 }
  0x57   : > { %p423_p5 = pnand %p422_p12, %p680_p11 }
  0x58   : > { %p428_p8 = por %p427_p4, %p426_p6 }
  0x59   : > { %p424_p7 = pneg %p423_p5 }
  0x5b   : > { %p429_p9 = pnand %p428_p8, %p424_p7 }
  0x5d   : > { %432 = shalt.err (!%p429_p9)
}
  0x5e   : > { %302 = dma.vmem_to_hbm [thread:$0]  (%p680_p11), %s201_s7, 128, %s198_s19, %s187_s22  }
  0x5f PF: > { %s212_s6 = sand.u32 1, %s463_s9   ;;  %p681_p13 = scmp.ne.s32.totalorder %s669_s16, 0 }
  0x60   : > { %p682_p10 = scmp.ge.s32.totalorder %s475_s12, 2  ;;  %s213_s8 = scalar_lea.sflag [#allocation4], %s212_s6 }
  0x62   : > { %p313_p1 = pnand %p682_p10, %p681_p13 }
  0x64   : > { %p314_p2 = pneg %p313_p1 }
  0x66   : > { %458 = dma.done.wait (%p314_p2), %s213_s8, 128  }
  0x67   : > { %460 = vsyncadd (%p314_p2), %s213_s8, 4294967168  ;;  %p16_p0 = scmp.ge.s32.totalorder %s543_s20, 4   ;;  %s683_s9 = smov %s467_s10 }
  0x68   : > { %s684_s10 = smov %s471_s11  ;;  %s685_s11 = smov %s570_s28 }
  0x69   : > { %s686_s12 = smov %s543_s20  ;;  %18 = sbr.rel (!%p16_p0) target bundleno = 6 (0x6), region = 77 }
  0x6e   :  { %218 = vsyncpa [#allocation3], 1 }
  0x6f   :  { %220 = vsyncpa [#allocation3 + $0x1], 1 }
  0x70   :  { %221 = vsyncpa [#allocation6], 1 }
  0x71   :  { %222 = vsyncpa [#allocation4], 1 }
  0x72   :  { %224 = vsyncpa [#allocation4 + $0x1], 1 }

</bundles_post_ra>
